<compile_context>
chip_gen: v6e
topology: v6e:2x2x1
jax: 0.10.0
libtpu: 0.0.40
codegen_flags: <defaults>
</compile_context>

<pallas_src>
import jax
import jax.numpy as jnp
from jax.experimental import pallas as pl
from jax.experimental.pallas import tpu as pltpu

SUBLANE = 8


def _round_up(x, m):
    return ((x + m - 1) // m) * m


def decoder_kernel(s_ref, a_ref, w1s_ref, w1a_ref, b1_ref,
                   w2_ref, b2_ref, w3_ref, b3_ref, o_ref):
    """Fused MLP decoder for one row tile.

    s_ref, a_ref : (TB, L)   latent_state / latent_action row tile
    w1s, w1a     : (L, H)    first Linear split into state/action halves
    b1, b2       : (1, H)
    w2           : (H, H)
    w3           : (H, Ap)   action head, Ap = action_dim padded to 8 lanes
    b3           : (1, Ap)
    o_ref        : (TB, Ap)  output tile
    """
    # Layer 1: cat([s, a], 1) @ W1.T  ==  s @ W1s + a @ W1a   (no concat in HBM)
    h = jnp.dot(s_ref[...], w1s_ref[...], preferred_element_type=jnp.float32)
    h = h + jnp.dot(a_ref[...], w1a_ref[...], preferred_element_type=jnp.float32)
    h = jnp.maximum(h + b1_ref[...], 0.0)

    # Layer 2 + ReLU
    h = jnp.dot(h, w2_ref[...], preferred_element_type=jnp.float32) + b2_ref[...]
    h = jnp.maximum(h, 0.0)

    # Layer 3 (raw action head, 8-lane padded)
    raw = jnp.dot(h, w3_ref[...], preferred_element_type=jnp.float32) + b3_ref[...]

    # Per-column head: tanh on col 0 (steering), sigmoid on cols 1,2 (gas, brake).
    # Single transcendental: tanh(x) = 2*sigmoid(2x) - 1, chosen per lane via
    # VALU selects (no XLU gather, one EUP pass instead of two).
    col = jax.lax.broadcasted_iota(jnp.int32, raw.shape, 1)
    is_tanh = col == 0
    z = jnp.where(is_tanh, 2.0 * raw, raw)
    sg = jax.nn.sigmoid(z)
    act = jnp.where(is_tanh, 2.0 * sg - 1.0, sg)
    o_ref[...] = act.astype(o_ref.dtype)


def deterministic_decoder_forward(latent_state, latent_action,
                                  w1, b1, w2, b2, w3, b3, *, row_tile=2048):
    """Matches DeterministicDecoder.forward (PyTorch nn.Linear convention: W is (out, in))."""
    b, latent_dim = latent_state.shape
    hidden = w1.shape[0]
    action_dim = w3.shape[0]
    f32 = jnp.float32

    # Split W1 (H, 2L) into state/action halves; transpose all weights for right-matmul.
    w1s = jnp.transpose(w1[:, :latent_dim]).astype(f32)              # (L, H)
    w1a = jnp.transpose(w1[:, latent_dim:]).astype(f32)              # (L, H)
    w2t = jnp.transpose(w2).astype(f32)                              # (H, H)

    # Pad action_dim (=3) only to the 8-element sublane granule (not 128 lanes):
    # cuts output HBM writeback ~16x vs the old 128-lane pad. Slice after call.
    ap = _round_up(action_dim, SUBLANE)
    w3t = jnp.zeros((hidden, ap), f32).at[:, :action_dim].set(jnp.transpose(w3).astype(f32))
    b3p = jnp.zeros((1, ap), f32).at[:, :action_dim].set(b3.astype(f32))
    b1r = b1.reshape(1, hidden).astype(f32)
    b2r = b2.reshape(1, hidden).astype(f32)

    s_in = latent_state.astype(f32)
    a_in = latent_action.astype(f32)

    # Row tiling over the batch. No wrapper-side jnp.pad (that was an extra full
    # read+write pass over the inputs in HBM); the ragged last block is handled
    # by Pallas and the garbage rows never survive the mandatory out[:b] slice.
    tb = min(row_tile, _round_up(b, SUBLANE))
    # v7x has 2 TensorCores: make sure the "parallel" grid has >=2 steps when
    # the batch is big enough to split (no-op for v5e/v6e, harmless there).
    if SUBLANE < b <= 2 * row_tile:
        tb = min(tb, _round_up(pl.cdiv(b, 2), SUBLANE))
    tb = max(tb, SUBLANE)
    grid = (pl.cdiv(b, tb),)

    row_spec = pl.BlockSpec((tb, latent_dim), lambda i: (i, 0))

    def full(shape):
        # Whole-array block, constant index -> DMA'd once, resident across the grid.
        return pl.BlockSpec(shape, lambda i: (0, 0))

    # Advisory cost hint so XLA schedules the surrounding transposes/slices well.
    flops = 2 * b * (2 * latent_dim * hidden + hidden * hidden + hidden * ap)
    bytes_accessed = 4 * (b * 2 * latent_dim + b * ap
                          + 2 * latent_dim * hidden + hidden * hidden + hidden * ap
                          + 2 * hidden + ap)
    cost = pl.CostEstimate(flops=flops,
                           transcendentals=b * ap,
                           bytes_accessed=bytes_accessed)

    out = pl.pallas_call(
        decoder_kernel,
        out_shape=jax.ShapeDtypeStruct((b, ap), f32),
        grid=grid,
        in_specs=[
            row_spec,                              # latent_state rows
            row_spec,                              # latent_action rows
            full((latent_dim, hidden)),            # w1 (state half)
            full((latent_dim, hidden)),            # w1 (action half)
            full((1, hidden)),                     # b1
            full((hidden, hidden)),                # w2
            full((1, hidden)),                     # b2
            full((hidden, ap)),                    # w3 (8-lane padded)
            full((1, ap)),                         # b3 (8-lane padded)
        ],
        out_specs=pl.BlockSpec((tb, ap), lambda i: (i, 0)),
        compiler_params=pltpu.CompilerParams(dimension_semantics=("parallel",)),
        cost_estimate=cost,
    )(s_in, a_in, w1s, w1a, b1r, w2t, b2r, w3t, b3p)

    # Mandatory: drops ragged-block garbage rows and the lane padding.
    return out[:b, :action_dim]


def reference_forward(latent_state, latent_action, w1, b1, w2, b2, w3, b3):
    """Plain-JAX reference of the PyTorch forward (sanity check)."""
    hp = jax.lax.Precision.HIGHEST
    x = jnp.concatenate([latent_state, latent_action], axis=1)
    h1 = jax.nn.relu(jnp.dot(x, w1.T, precision=hp) + b1)
    h2 = jax.nn.relu(jnp.dot(h1, w2.T, precision=hp) + b2)
    raw = jnp.dot(h2, w3.T, precision=hp) + b3
    steering = jnp.tanh(raw[:, 0])
    gas = jax.nn.sigmoid(raw[:, 1])
    brake = jax.nn.sigmoid(raw[:, 2])
    return jnp.stack([steering, gas, brake], axis=1)


if __name__ == "__main__":
    # Small shapes consistent with the module.
    B, LATENT_DIM, ACTION_DIM, HIDDEN_DIM = 2, 8, 3, 32

    key = jax.random.PRNGKey(0)
    keys = jax.random.split(key, 8)

    def linear_init(kw, kb, out_f, in_f):
        bound = in_f ** -0.5
        w = jax.random.uniform(kw, (out_f, in_f), minval=-bound, maxval=bound, dtype=jnp.float32)
        b = jax.random.uniform(kb, (out_f,), minval=-bound, maxval=bound, dtype=jnp.float32)
        return w, b

    w1, b1 = linear_init(keys[0], keys[1], HIDDEN_DIM, 2 * LATENT_DIM)
    w2, b2 = linear_init(keys[2], keys[3], HIDDEN_DIM, HIDDEN_DIM)
    w3, b3 = linear_init(keys[4], keys[5], ACTION_DIM, HIDDEN_DIM)

    latent_state = jax.random.normal(keys[6], (B, LATENT_DIM), dtype=jnp.float32)
    latent_action = jax.random.normal(keys[7], (B, LATENT_DIM), dtype=jnp.float32)

    out = deterministic_decoder_forward(latent_state, latent_action,
                                        w1, b1, w2, b2, w3, b3)
    out = jax.block_until_ready(out)

    ref = reference_forward(latent_state, latent_action, w1, b1, w2, b2, w3, b3)
    assert out.shape == (B, ACTION_DIM)
    assert jnp.allclose(out, ref, atol=2e-3, rtol=2e-3), float(jnp.max(jnp.abs(out - ref)))

    # TODO(synk): DeterministicDecoder.loss() does a host-side numpy bounds-penalty
    # round-trip; only the forward pass is implemented as a kernel here.
    print("KERNEL_OK")
</pallas_src>

<mosaic_0001>
module attributes {stable_mosaic.version = 11 : i64} {
  func.func @decoder_kernel(%arg0: i32, %arg1: memref<8x8xf32, #tpu.memory_space<vmem>>, %arg2: memref<8x8xf32, #tpu.memory_space<vmem>>, %arg3: memref<8x32xf32, #tpu.memory_space<vmem>>, %arg4: memref<8x32xf32, #tpu.memory_space<vmem>>, %arg5: memref<1x32xf32, #tpu.memory_space<vmem>>, %arg6: memref<32x32xf32, #tpu.memory_space<vmem>>, %arg7: memref<1x32xf32, #tpu.memory_space<vmem>>, %arg8: memref<32x8xf32, #tpu.memory_space<vmem>>, %arg9: memref<1x8xf32, #tpu.memory_space<vmem>>, %arg10: memref<8x8xf32, #tpu.memory_space<vmem>>) attributes {dimension_semantics = [#tpu.dimension_semantics<parallel>], iteration_bounds = array<i64: 1>, scalar_prefetch = 0 : i64, scratch_operands = 0 : i64, tpu.core_type = #tpu.core_type<tc>, window_params = [{transform_indices = @transform_0, window_bounds = array<i64: 8, 8>}, {transform_indices = @transform_1, window_bounds = array<i64: 8, 8>}, {pipeline_mode = #tpu.pipeline_mode<synchronous>, transform_indices = @transform_2, window_bounds = array<i64: 8, 32>}, {pipeline_mode = #tpu.pipeline_mode<synchronous>, transform_indices = @transform_3, window_bounds = array<i64: 8, 32>}, {pipeline_mode = #tpu.pipeline_mode<synchronous>, transform_indices = @transform_4, window_bounds = array<i64: 1, 32>}, {pipeline_mode = #tpu.pipeline_mode<synchronous>, transform_indices = @transform_5, window_bounds = array<i64: 32, 32>}, {pipeline_mode = #tpu.pipeline_mode<synchronous>, transform_indices = @transform_6, window_bounds = array<i64: 1, 32>}, {pipeline_mode = #tpu.pipeline_mode<synchronous>, transform_indices = @transform_7, window_bounds = array<i64: 32, 8>}, {pipeline_mode = #tpu.pipeline_mode<synchronous>, transform_indices = @transform_8, window_bounds = array<i64: 1, 8>}, {transform_indices = @transform_9, window_bounds = array<i64: 8, 8>}]} {
    %c0 = arith.constant 0 : index
    %c0_0 = arith.constant 0 : index
    %0 = vector.load %arg1[%c0, %c0_0] : memref<8x8xf32, #tpu.memory_space<vmem>>, vector<8x8xf32>
    %c0_1 = arith.constant 0 : index
    %c0_2 = arith.constant 0 : index
    %1 = vector.load %arg3[%c0_1, %c0_2] : memref<8x32xf32, #tpu.memory_space<vmem>>, vector<8x32xf32>
    %cst = arith.constant dense<0.000000e+00> : vector<8x32xf32>
    %2 = tpu.matmul %0, %1, %cst {dimension_numbers = #tpu.dot_dimension_numbers<[1], [0], [0], [1], [0, 0, 1, 1], [], []>} : vector<8x8xf32>, vector<8x32xf32>, vector<8x32xf32> -> vector<8x32xf32>
    %c0_3 = arith.constant 0 : index
    %c0_4 = arith.constant 0 : index
    %3 = vector.load %arg2[%c0_3, %c0_4] : memref<8x8xf32, #tpu.memory_space<vmem>>, vector<8x8xf32>
    %c0_5 = arith.constant 0 : index
    %c0_6 = arith.constant 0 : index
    %4 = vector.load %arg4[%c0_5, %c0_6] : memref<8x32xf32, #tpu.memory_space<vmem>>, vector<8x32xf32>
    %cst_7 = arith.constant dense<0.000000e+00> : vector<8x32xf32>
    %5 = tpu.matmul %3, %4, %cst_7 {dimension_numbers = #tpu.dot_dimension_numbers<[1], [0], [0], [1], [0, 0, 1, 1], [], []>} : vector<8x8xf32>, vector<8x32xf32>, vector<8x32xf32> -> vector<8x32xf32>
    %6 = arith.addf %2, %5 : vector<8x32xf32>
    %c0_8 = arith.constant 0 : index
    %c0_9 = arith.constant 0 : index
    %7 = vector.load %arg5[%c0_8, %c0_9] : memref<1x32xf32, #tpu.memory_space<vmem>>, vector<1x32xf32>
    %8 = vector.broadcast %7 : vector<1x32xf32> to vector<8x32xf32>
    %9 = arith.addf %6, %8 : vector<8x32xf32>
    %cst_10 = arith.constant 0.000000e+00 : f32
    %10 = vector.broadcast %cst_10 : f32 to vector<8x32xf32>
    %11 = arith.maximumf %9, %10 : vector<8x32xf32>
    %c0_11 = arith.constant 0 : index
    %c0_12 = arith.constant 0 : index
    %12 = vector.load %arg6[%c0_11, %c0_12] : memref<32x32xf32, #tpu.memory_space<vmem>>, vector<32x32xf32>
    %cst_13 = arith.constant dense<0.000000e+00> : vector<8x32xf32>
    %13 = tpu.matmul %11, %12, %cst_13 {dimension_numbers = #tpu.dot_dimension_numbers<[1], [0], [0], [1], [0, 0, 1, 1], [], []>} : vector<8x32xf32>, vector<32x32xf32>, vector<8x32xf32> -> vector<8x32xf32>
    %c0_14 = arith.constant 0 : index
    %c0_15 = arith.constant 0 : index
    %14 = vector.load %arg7[%c0_14, %c0_15] : memref<1x32xf32, #tpu.memory_space<vmem>>, vector<1x32xf32>
    %15 = vector.broadcast %14 : vector<1x32xf32> to vector<8x32xf32>
    %16 = arith.addf %13, %15 : vector<8x32xf32>
    %cst_16 = arith.constant 0.000000e+00 : f32
    %17 = vector.broadcast %cst_16 : f32 to vector<8x32xf32>
    %18 = arith.maximumf %16, %17 : vector<8x32xf32>
    %c0_17 = arith.constant 0 : index
    %c0_18 = arith.constant 0 : index
    %19 = vector.load %arg8[%c0_17, %c0_18] : memref<32x8xf32, #tpu.memory_space<vmem>>, vector<32x8xf32>
    %cst_19 = arith.constant dense<0.000000e+00> : vector<8x8xf32>
    %20 = tpu.matmul %18, %19, %cst_19 {dimension_numbers = #tpu.dot_dimension_numbers<[1], [0], [0], [1], [0, 0, 1, 1], [], []>} : vector<8x32xf32>, vector<32x8xf32>, vector<8x8xf32> -> vector<8x8xf32>
    %c0_20 = arith.constant 0 : index
    %c0_21 = arith.constant 0 : index
    %21 = vector.load %arg9[%c0_20, %c0_21] : memref<1x8xf32, #tpu.memory_space<vmem>>, vector<1x8xf32>
    %22 = vector.broadcast %21 : vector<1x8xf32> to vector<8x8xf32>
    %23 = arith.addf %20, %22 : vector<8x8xf32>
    %24 = tpu.iota {dimensions = array<i32: 1>} : vector<8x8xi32>
    %c0_i32 = arith.constant 0 : i32
    %25 = vector.broadcast %c0_i32 : i32 to vector<8x8xi32>
    %26 = arith.cmpi eq, %24, %25 : vector<8x8xi32>
    %cst_22 = arith.constant 2.000000e+00 : f32
    %27 = vector.broadcast %cst_22 : f32 to vector<8x8xf32>
    %28 = arith.mulf %27, %23 : vector<8x8xf32>
    %29 = arith.select %26, %28, %23 : vector<8x8xi1>, vector<8x8xf32>
    %30 = arith.negf %29 : vector<8x8xf32>
    %31 = math.exp %30 : vector<8x8xf32>
    %cst_23 = arith.constant 1.000000e+00 : f32
    %32 = vector.broadcast %cst_23 : f32 to vector<8x8xf32>
    %33 = arith.addf %32, %31 : vector<8x8xf32>
    %34 = arith.divf %32, %33 : vector<8x8xf32>
    %cst_24 = arith.constant 2.000000e+00 : f32
    %35 = vector.broadcast %cst_24 : f32 to vector<8x8xf32>
    %36 = arith.mulf %35, %34 : vector<8x8xf32>
    %cst_25 = arith.constant 1.000000e+00 : f32
    %37 = vector.broadcast %cst_25 : f32 to vector<8x8xf32>
    %38 = arith.subf %36, %37 : vector<8x8xf32>
    %39 = arith.select %26, %38, %34 : vector<8x8xi1>, vector<8x8xf32>
    %c0_26 = arith.constant 0 : index
    %c0_27 = arith.constant 0 : index
    %40 = vector.load %arg10[%c0_26, %c0_27] : memref<8x8xf32, #tpu.memory_space<vmem>>, vector<8x8xf32>
    tpu.vector_store %arg10[%c0_26, %c0_27], %39 {strides = array<i32>} : memref<8x8xf32, #tpu.memory_space<vmem>>, vector<8x8xf32>,
    return
  }
  func.func @transform_0(%arg0: i32) -> (i32, i32) {
    %c0_i32 = arith.constant 0 : i32
    %c0_i32_0 = arith.constant 0 : i32
    return %arg0, %c0_i32 : i32, i32
  }
  func.func @transform_1(%arg0: i32) -> (i32, i32) {
    %c0_i32 = arith.constant 0 : i32
    %c0_i32_0 = arith.constant 0 : i32
    return %arg0, %c0_i32 : i32, i32
  }
  func.func @transform_2(%arg0: i32) -> (i32, i32) {
    %c0_i32 = arith.constant 0 : i32
    %c0_i32_0 = arith.constant 0 : i32
    %c0_i32_1 = arith.constant 0 : i32
    return %c0_i32, %c0_i32_0 : i32, i32
  }
  func.func @transform_3(%arg0: i32) -> (i32, i32) {
    %c0_i32 = arith.constant 0 : i32
    %c0_i32_0 = arith.constant 0 : i32
    %c0_i32_1 = arith.constant 0 : i32
    return %c0_i32, %c0_i32_0 : i32, i32
  }
  func.func @transform_4(%arg0: i32) -> (i32, i32) {
    %c0_i32 = arith.constant 0 : i32
    %c0_i32_0 = arith.constant 0 : i32
    %c0_i32_1 = arith.constant 0 : i32
    return %c0_i32, %c0_i32_0 : i32, i32
  }
  func.func @transform_5(%arg0: i32) -> (i32, i32) {
    %c0_i32 = arith.constant 0 : i32
    %c0_i32_0 = arith.constant 0 : i32
    %c0_i32_1 = arith.constant 0 : i32
    return %c0_i32, %c0_i32_0 : i32, i32
  }
  func.func @transform_6(%arg0: i32) -> (i32, i32) {
    %c0_i32 = arith.constant 0 : i32
    %c0_i32_0 = arith.constant 0 : i32
    %c0_i32_1 = arith.constant 0 : i32
    return %c0_i32, %c0_i32_0 : i32, i32
  }
  func.func @transform_7(%arg0: i32) -> (i32, i32) {
    %c0_i32 = arith.constant 0 : i32
    %c0_i32_0 = arith.constant 0 : i32
    %c0_i32_1 = arith.constant 0 : i32
    return %c0_i32, %c0_i32_0 : i32, i32
  }
  func.func @transform_8(%arg0: i32) -> (i32, i32) {
    %c0_i32 = arith.constant 0 : i32
    %c0_i32_0 = arith.constant 0 : i32
    %c0_i32_1 = arith.constant 0 : i32
    return %c0_i32, %c0_i32_0 : i32, i32
  }
  func.func @transform_9(%arg0: i32) -> (i32, i32) {
    %c0_i32 = arith.constant 0 : i32
    %c0_i32_0 = arith.constant 0 : i32
    return %arg0, %c0_i32 : i32, i32
  }
}

</mosaic_0001>

<bundles_post_ra>
// kernel: tpu_custom_call.1
= control target key start
LH: loop header
LB: loop body
LE: loop exit
PB: predicated region body
PF: predicated region fallthrough
CT: control target
= control target key end

     0   :  { %14 = vsyncpa [#allocation3], 0  ;;  %s675_s0 = inlined_call_operand.hbm [shape: f32[2,8], index: 0, kind: input, shape index: {}]   ;;  %s676_s1 = inlined_call_operand.hbm [shape: f32[2,8], index: 1, kind: input, shape index: {}]   ;;  %s677_s2 = inlined_call_operand.vmem [shape: f32[8,32], index: 2, kind: input, shape index: {}]   ;;  %s678_s3 = inlined_call_operand.vmem [shape: f32[8,32], index: 3, kind: input, shape index: {}]   ;;  %s679_s4 = inlined_call_operand.vmem [shape: f32[1,32], index: 4, kind: input, shape index: {}]   ;;  %s680_s5 = inlined_call_operand.vmem [shape: f32[32,32], index: 5, kind: input, shape index: {}]   ;;  %s681_s6 = inlined_call_operand.vmem [shape: f32[1,32], index: 6, kind: input, shape index: {}]   ;;  %s682_s7 = inlined_call_operand.vmem [shape: f32[32,8], index: 7, kind: input, shape index: {}]   ;;  %s683_s8 = inlined_call_operand.vmem [shape: f32[1,8], index: 8, kind: input, shape index: {}]   ;;  %s684_s9 = inlined_call_operand.hbm [shape: f32[2,8], index: 9, kind: output, shape index: {}]  }
   0x1   :  { %15 = vsyncpa [#allocation6], 0 }
   0x2   :  { %16 = vsyncpa [#allocation4], 0 }
   0x3   :  { %21 = vsyncadd [#allocation3], 96  ;;  %s556_s30 = smov [#allocation2]  }
   0x4   :  { %s22_s10 = sshll.u32 %s556_s30, 4  ;;  %s23_s10 = int_to_ptr.vmem [resolvable:$true] %s22_s10 }
   0x5   :  { %s498_s11 = scalar_lea.vmem %s23_s10, 32  ;;  %s502_s12 = scalar_lea.vmem %s23_s10, 128 }
   0x6   :  { %p499_p0 = scmp.ne.s32.totalorder %s23_s10, %s498_s11  ;;  %p503_p1 = scmp.lt.s32.totalorder %s23_s10, %s23_s10 }
   0x7   :  { %p504_p2 = scmp.lt.s32.totalorder %s502_s12, %s498_s11 }
   0x9   :  { %p505_p3 = por %p504_p2, %p503_p1 }
   0xb   :  { %p506_p4 = pnand %p505_p3, %p499_p0 }
   0xd   :  { %509 = shalt.err (!%p506_p4)
}
   0xe   :  { %s557_s13 = smov 32   ;;  %s558_s14 = smov 2  }
   0xf   :  { %28 = dma.hbm_to_vmem [thread:$0]  %s675_s0, 32, %s23_s10, [#allocation3], %s557_s13, %s557_s13, %s558_s14  }
  0x10   :  { %33 = vsyncadd [#allocation6], 96  ;;  %s559_s17 = smov [#allocation5]  }
  0x11   :  { %s34_s18 = sshll.u32 %s559_s17, 4  ;;  %s35_s18 = int_to_ptr.vmem [resolvable:$true] %s34_s18 }
  0x12   :  { %s518_s19 = scalar_lea.vmem %s35_s18, 32  ;;  %s522_s20 = scalar_lea.vmem %s35_s18, 128 }
  0x13   :  { %p519_p5 = scmp.ne.s32.totalorder %s35_s18, %s518_s19  ;;  %p523_p6 = scmp.lt.s32.totalorder %s35_s18, %s35_s18 }
  0x14   :  { %p524_p7 = scmp.lt.s32.totalorder %s522_s20, %s518_s19 }
  0x16   :  { %p525_p8 = por %p524_p7, %p523_p6 }
  0x18   :  { %p526_p9 = pnand %p525_p8, %p519_p5 }
  0x1a   :  { %529 = shalt.err (!%p526_p9)
}
  0x1b   :  { %40 = dma.hbm_to_vmem [thread:$0]  %s676_s1, 32, %s35_s18, [#allocation6], %s557_s13, %s557_s13, %s558_s14  }
  0x1c   :  { %550 = dma.done.wait [#allocation3], 128  }
  0x1d   :  { %551 = vsyncadd [#allocation3], 4294967168 }
  0x1e   :  { %552 = dma.done.wait [#allocation6], 128  }
  0x1f   :  { %553 = vsyncadd [#allocation6], 4294967168  ;;  %v560_v0 = vmov 0.0   ;;  %vm561_vm0 = vmmov 0   ;;  %vm65_vm1 = vcmask 64512   ;;  %v64_v1 = vld [vmem:[%s678_s3] sm:$0xff]  ;;  %v391_v26 = vlaneseq }
  0x20   :  { %447 = vmatprep.subr.mxu0 %v560_v0  ;;  %452 = vmatprep.subr.mxu1 %v560_v0  ;;  %v62_v2 = vld [vmem:[%s677_s2] sm:$0xff]  ;;  %v63_v3 = vld [vmem:[#allocation5] sm:$0xff]  ;;  %v224_v5 = vld [vmem:[%s680_s5 + $0x18] sm:$0xff]  ;;  %vm232_vm2 = vcmask 261120  }
  0x21   :  { %449 = vmatprep.mubr.msk.f32.mxu0 %vm561_vm0, %v560_v0  ;;  %454 = vmatprep.mubr.msk.f32.mxu1 %vm561_vm0, %v560_v0  ;;  %v61_v4 = vld [vmem:[#allocation2] sm:$0xff]  ;;  %v223_v6 = vld [vmem:[%s680_s5 + $0x10] sm:$0xff]  ;;  %v222_v7 = vld [vmem:[%s680_s5 + $0x8] sm:$0xff]  ;;  %v392_v28 = vand.u32 127, %v391_v26 }
  0x22   :  { %448 = vmatpush3.msra.mxu0 %v64_v1  ;;  %453 = vmatpush3.msra.mxu1 %v62_v2  ;;  %v221_v8 = vld [vmem:[%s680_s5] sm:$0xff]  ;;  %v310_v9 = vld [vmem:[%s682_s7 + $0x18] sm:$0xff]  ;;  %v309_v18 = vld [vmem:[%s682_s7 + $0x10] sm:$0xff] }
  0x23   :  { %450 = vmatmul.mubr.msk.f32.vlgmr.msra.gmra.mxu0 %vm65_vm1, %v63_v3  ;;  %455 = vmatmul.mubr.msk.f32.vlgmr.msra.gmra.mxu1 %vm65_vm1, %v61_v4  ;;  %v426_v12 = vld [vmem:[%s679_s4] ss:$0 sm:$0xff]  ;;  %v308_v19 = vld [vmem:[%s682_s7 + $0x8] sm:$0xff]  ;;  %vm393_vm3 = vcmp.eq.s32.totalorder %v392_v28, 0 }
  0x24   :  { %457 = vmatprep.subr.mxu0 %v560_v0  ;;  %465 = vmatprep.mubr.msk.f32.mxu0 %vm561_vm0, %v560_v0  ;;  %v307_v20 = vld [vmem:[%s682_s7] sm:$0xff] }
  0x25   :  { %468 = vmatprep.subr.mxu1 %v560_v0  ;;  %476 = vmatprep.mubr.msk.f32.mxu1 %vm561_vm0, %v560_v0  ;;  %v427_v21 = vld [vmem:[%s681_s6] ss:$0 sm:$0xff] }
  0x26   :  { %458 = vmatpush3.msra.mxu0 %v224_v5  ;;  %469 = vmatpush3.msra.mxu1 %v310_v9  ;;  %v429_v27 = vld [vmem:[%s683_s8] ss:$0 sm:$0xff] }
  0x27   :  { %459 = vmatprep.subr.mxu0 %v560_v0  ;;  %470 = vmatprep.subr.mxu1 %v560_v0 }
  0x28   :  { %460 = vmatpush3.msra.mxu0 %v223_v6  ;;  %471 = vmatpush3.msra.mxu1 %v309_v18 }
  0x29   :  { %461 = vmatprep.subr.mxu0 %v560_v0  ;;  %472 = vmatprep.subr.mxu1 %v560_v0 }
  0x2a   :  { %462 = vmatpush3.msra.mxu0 %v222_v7  ;;  %473 = vmatpush3.msra.mxu1 %v308_v19 }
  0x2b   :  { %463 = vmatprep.subr.mxu0 %v560_v0  ;;  %474 = vmatprep.subr.mxu1 %v560_v0 }
  0x2c   :  { %464 = vmatpush3.msra.mxu0 %v221_v8  ;;  %475 = vmatpush3.msra.mxu1 %v307_v20 }
  0xe3   :  { %v135_v10 = vpop.f32.mrf.mxu0  ;;  %v208_v11 = vpop.f32.mrf.mxu1 }
  0xe4   :  { %v209_v13 = vadd.f32 %v208_v11, %v135_v10 }
  0xe5   :  { %v451_v14 = vpop.f32.mrf.mxu0  ;;  %v456_v15 = vpop.f32.mrf.mxu1 }
  0xe6   :  { %v219_v16 = vadd.f32 %v426_v12, %v209_v13 }
  0xe8   :  { %v220_v17 = vmax.f32 %v219_v16, 0.0 }
  0xea   :  { %466 = vmatmul.mubr.msk.f32.vlgmr.msra.gmra.mxu0 %vm232_vm2, %v220_v17 }
 0x1aa   :  { %v302_v22 = vpop.f32.mrf.mxu0 }
 0x1ab   :  { %v303_v23 = vadd.f32 %v427_v21, %v302_v22 }
 0x1ac   :  { %v467_v24 = vpop.f32.mrf.mxu0 }
 0x1ad   :  { %v306_v25 = vmax.f32 %v303_v23, 0.0 }
 0x1af   :  { %477 = vmatmul.mubr.msk.f32.vlgmr.msra.gmra.mxu1 %vm232_vm2, %v306_v25 }
 0x26f   :  { %v387_v29 = vpop.f32.mrf.mxu1 }
 0x270   :  { %v388_v30 = vadd.f32 %v429_v27, %v387_v29 }
 0x271   :  { %v478_v31 = vpop.f32.mrf.mxu1 }
 0x272   :  { %v394_v32 = vmul.f32 2.0, %v388_v30 }
 0x274   :  { %v395_v33 = vsel %vm393_vm3, %v394_v32, %v388_v30 }
 0x275   :  { %v431_v34 = vmul.f32 -1.442695, %v395_v33 }
 0x277   :  { %486 = vpow2.f32 %v431_v34 }
 0x284   :  { %v487_v35 = vpop.eup %486 }
 0x285   :  { %v399_v36 = vadd.f32 1.0, %v487_v35 }
 0x287   :  { %488 = vrcp.f32 %v399_v36 }
 0x294   :  { %v489_v37 = vpop.eup %488 }
 0x295   :  { %v402_v38 = vmul.f32 2.0, %v489_v37 }
 0x297   :  { %v432_v39 = vadd.f32 -1.0, %v402_v38 }
 0x299   :  { %v404_v40 = vsel %vm393_vm3, %v432_v39, %v489_v37 }
 0x29a   :  { %405 = vst.msk [vmem:[#allocation7] sm:$0xff] %vm65_vm1, %v404_v40 }
 0x29b   :  { %410 = vsyncadd [#allocation4], 96  ;;  %s562_s6 = smov [#allocation7]  }
 0x29c   :  { %s411_s7 = sshll.u32 %s562_s6, 4  ;;  %s412_s7 = int_to_ptr.vmem [resolvable:$true] %s411_s7 }
 0x29d   :  { %s530_s8 = scalar_lea.vmem %s412_s7, 32  ;;  %s534_s23 = scalar_lea.vmem %s412_s7, 128 }
 0x29e   :  { %p531_p10 = scmp.ne.s32.totalorder %s412_s7, %s530_s8  ;;  %p535_p11 = scmp.lt.s32.totalorder %s412_s7, %s412_s7 }
 0x29f   :  { %p536_p12 = scmp.lt.s32.totalorder %s534_s23, %s530_s8 }
 0x2a1   :  { %p537_p13 = por %p536_p12, %p535_p11 }
 0x2a3   :  { %p538_p0 = pnand %p537_p13, %p531_p10 }
 0x2a5   :  { %541 = shalt.err (!%p538_p0)
}
 0x2a6   :  { %417 = dma.vmem_to_hbm [thread:$0]  %s412_s7, 32, %s684_s9, [#allocation4], %s557_s13, %s557_s13, %s558_s14  }
 0x2a7   :  { %554 = dma.done.wait [#allocation4], 128  }
 0x2a8   :  { %555 = vsyncadd [#allocation4], 4294967168 }
 0x2a9   :  { %421 = vsyncpa [#allocation3], 1 }
 0x2aa   :  { %422 = vsyncpa [#allocation6], 1 }
 0x2ab   :  { %423 = vsyncpa [#allocation4], 1 }

</bundles_post_ra>
